<compile_context>
chip_gen: v7x
topology: tpu7x:2x2x1
jax: 0.10.0
libtpu: 0.0.40
codegen_flags: <defaults>
</compile_context>

<pallas_src>
import functools
import math

import jax
import jax.numpy as jnp
from jax.experimental import pallas as pl
from jax.experimental.pallas import tpu as pltpu


def _dwconv1d_kernel(x_ref, w_ref, b_ref, o_ref, *, padding):
    # Layout: lanes = (batch * channel) columns, sublanes = sequence positions.
    #   x_ref : (L,     Ct)
    #   w_ref : (K,     Ct)   per-lane taps  (lane r -> channel r % C)
    #   b_ref : (1,     Ct)   per-lane bias
    #   o_ref : (L_out, Ct)
    _, Ct = x_ref.shape
    K = w_ref.shape[0]
    L_out = o_ref.shape[0]

    x = x_ref[...].astype(jnp.float32)      # single load + cast of the tile
    w = w_ref[...].astype(jnp.float32)      # loaded / cast once, not per tap
    b = b_ref[...].astype(jnp.float32)      # (1, Ct)

    # Zero padding built in register space (no scratch, no extra VMEM traffic).
    if padding > 0:
        zpad = jnp.zeros((padding, Ct), jnp.float32)
        xp = jnp.concatenate([zpad, x, zpad], axis=0)      # (L + 2p, Ct)
    else:
        xp = x

    # f32 accumulation (required: no bf16 VPU on v5e); bias broadcast hoisted.
    acc = jnp.zeros((L_out, Ct), jnp.float32) + b

    # Static unroll over the K taps: each tap is a sublane-shifted view of the
    # in-register padded tile (XLU slot) times a per-lane scalar row (VPU).
    for k in range(K):
        acc = acc + xp[k:k + L_out, :] * w[k:k + 1, :]

    o_ref[...] = acc.astype(o_ref.dtype)


def _pick_lane_tile(rows, C, per_lane_bytes, budget_bytes):
    """Lane-tile width (columns of the (L, N*C) view per block).

    Legal lane block widths are multiples of 128 or the full lane extent.  We
    additionally prefer multiples of C so the per-lane weight/bias block is
    identical for every grid step (=> resident in VMEM, DMA'd exactly once).
    """
    cap = max(128, budget_bytes // max(per_lane_bytes, 1))
    lcm = 128 * C // math.gcd(128, C)
    if rows <= cap:
        # Whole lane axis fits one block.  Split in two when cleanly possible
        # so both v7x TensorCores get work and DMA/compute overlap is kept.
        half = rows // 2
        if rows >= 2 * lcm and half % lcm == 0:
            return half
        return rows
    if lcm <= cap:
        return (cap // lcm) * lcm
    # Awkward C (lcm(128, C) too big): fall back to plain 128-multiples; the
    # wrapper then ships per-tile weight blocks instead of a resident one.
    return (cap // 128) * 128


@functools.partial(jax.jit, static_argnames=("padding",))
def depthwise_conv1d(x, weight, bias, *, padding: int):
    """Matches nn.Conv1d(C, C, K, padding=p, groups=C).

    x:      (N, C, L)
    weight: (C, 1, K)   -- PyTorch Conv1d weight layout for groups=C
    bias:   (C,)
    returns (N, C, L + 2*padding - K + 1)
    """
    N, C, L = x.shape
    K = weight.shape[-1]
    Lp = L + 2 * padding
    L_out = Lp - K + 1
    rows = N * C

    # Channels-last ("lane-dense") view: the large N*C dim goes on the lane
    # axis; pure layout plumbing.  Lane r corresponds to channel r % C.
    x_t = x.reshape(rows, L).T                               # (L, rows)

    itemsize = jnp.dtype(x.dtype).itemsize
    # Rough per-lane-column VMEM cost of one block: double-buffered in/out
    # tiles in the I/O dtype + f32 padded copy, accumulator and tap temps.
    per_lane = 2 * itemsize * (L + L_out) + 4 * (Lp + 3 * L_out) + 8 * (K + 1)
    try:   # generation-aware sizing (v7x: 64 MiB VMEM; v5e/v6e: 128 MiB)
        vmem_phys = int(getattr(pltpu.get_tpu_info(),
                                "vmem_capacity_bytes", 128 << 20))
    except Exception:
        vmem_phys = 128 << 20
    vmem_limit = int(min(vmem_phys // 2, 64 << 20))
    c_tile = _pick_lane_tile(rows, C, per_lane, vmem_limit // 2)

    grid = (pl.cdiv(rows, c_tile),)

    # Per-lane taps / bias.  Resident case (c_tile % C == 0): replicated only
    # to one tile width and DMA'd once for the whole grid (index_map (0, 0)).
    resident = (c_tile == rows) or (c_tile % C == 0)
    w_width = c_tile if resident else rows
    wT = weight.reshape(C, K).T.astype(jnp.float32)          # (K, C)
    w_arr = jnp.tile(wT, (1, w_width // C))                  # (K, w_width)
    b_arr = jnp.tile(bias.reshape(1, C).astype(jnp.float32),
                     (1, w_width // C))                      # (1, w_width)
    w_map = (lambda i: (0, 0)) if resident else (lambda i: (0, i))

    out_t = pl.pallas_call(
        functools.partial(_dwconv1d_kernel, padding=padding),
        out_shape=jax.ShapeDtypeStruct((L_out, rows), x.dtype),
        grid_spec=pltpu.PrefetchScalarGridSpec(
            num_scalar_prefetch=0,
            grid=grid,
            in_specs=[
                # TODO(synk): for very long L add a second grid axis over L
                # with a (K-1)-element halo so block height stays bounded
                # independently of L (matters most on v7x's 64 MiB VMEM).
                pl.BlockSpec((L, c_tile), lambda i: (0, i)),
                pl.BlockSpec((K, c_tile), w_map),
                pl.BlockSpec((1, c_tile), w_map),
            ],
            out_specs=pl.BlockSpec((L_out, c_tile), lambda i: (0, i)),
        ),
        compiler_params=pltpu.CompilerParams(
            # Lane tiles are independent -> shard across TensorCores (v7x).
            dimension_semantics=("parallel",),
            vmem_limit_bytes=vmem_limit,
        ),
        cost_estimate=pl.CostEstimate(
            flops=2 * K * rows * L_out + rows * L_out,
            transcendentals=0,
            bytes_accessed=rows * (L + L_out) * itemsize + (K + 1) * w_width * 4,
        ),
    )(x_t, w_arr, b_arr)

    return out_t.T.reshape(N, C, L_out)


def _reference(x, weight, bias, padding):
    # Pure-JAX reference (depthwise conv via grouped conv_general_dilated).
    C = x.shape[1]
    return jax.lax.conv_general_dilated(
        x, weight,
        window_strides=(1,),
        padding=[(padding, padding)],
        dimension_numbers=("NCH", "OIH", "NCH"),
        feature_group_count=C,
    ) + bias.reshape(1, C, 1)


if __name__ == "__main__":
    key = jax.random.PRNGKey(0)

    def run_case(N, C, L, K, P, kseed):
        kx, kw, kb = jax.random.split(kseed, 3)
        x = jax.random.normal(kx, (N, C, L), dtype=jnp.float32)
        # Shapes match nn.Conv1d with groups=C:
        # weight (out_channels, in_channels/groups=1, K), bias (out_channels,)
        weight = jax.random.normal(kw, (C, 1, K), dtype=jnp.float32) * 0.1
        bias = jax.random.normal(kb, (C,), dtype=jnp.float32) * 0.1
        out = jax.block_until_ready(
            depthwise_conv1d(x, weight, bias, padding=P))
        ref = _reference(x, weight, bias, P)
        assert out.shape == (N, C, L + 2 * P - K + 1)
        assert jnp.allclose(out, ref, atol=1e-5, rtol=1e-5), (
            "mismatch: max err %e" % float(jnp.max(jnp.abs(out - ref))))

    k1, k2 = jax.random.split(key)
    # Module config: DepthWiseConv1d(in_channels=8, out_channels=8,
    #                                kernel_size=3, padding=1), batch=2, L=16.
    run_case(2, 8, 16, 3, 1, k1)
    # Larger config exercising the tiled / resident-weight path (grid > 1).
    run_case(2, 128, 32, 3, 1, k2)

    print("KERNEL_OK")
</pallas_src>

<mosaic_0001>
module attributes {stable_mosaic.version = 11 : i64} {
  func.func @_dwconv1d_kernel(%arg0: i32, %arg1: memref<16x16xf32, #tpu.memory_space<vmem>>, %arg2: memref<3x16xf32, #tpu.memory_space<vmem>>, %arg3: memref<1x16xf32, #tpu.memory_space<vmem>>, %arg4: memref<16x16xf32, #tpu.memory_space<vmem>>) attributes {dimension_semantics = [#tpu.dimension_semantics<parallel>], iteration_bounds = array<i64: 1>, scalar_prefetch = 0 : i64, scratch_operands = 0 : i64, tpu.core_type = #tpu.core_type<tc>, window_params = [{transform_indices = @transform_0, window_bounds = array<i64: 16, 16>}, {pipeline_mode = #tpu.pipeline_mode<synchronous>, transform_indices = @transform_1, window_bounds = array<i64: 3, 16>}, {pipeline_mode = #tpu.pipeline_mode<synchronous>, transform_indices = @transform_2, window_bounds = array<i64: 1, 16>}, {transform_indices = @transform_3, window_bounds = array<i64: 16, 16>}]} {
    %c0 = arith.constant 0 : index
    %c0_0 = arith.constant 0 : index
    %0 = vector.load %arg1[%c0, %c0_0] : memref<16x16xf32, #tpu.memory_space<vmem>>, vector<16x16xf32>
    %c0_1 = arith.constant 0 : index
    %c0_2 = arith.constant 0 : index
    %1 = vector.load %arg2[%c0_1, %c0_2] : memref<3x16xf32, #tpu.memory_space<vmem>>, vector<3x16xf32>
    %c0_3 = arith.constant 0 : index
    %c0_4 = arith.constant 0 : index
    %2 = vector.load %arg3[%c0_3, %c0_4] : memref<1x16xf32, #tpu.memory_space<vmem>>, vector<1x16xf32>
    %cst = arith.constant 0.000000e+00 : f32
    %3 = vector.broadcast %cst : f32 to vector<1x16xf32>
    %4 = tpu.concatenate %3, %0, %3 in 0 : vector<1x16xf32>, vector<16x16xf32>, vector<1x16xf32> -> vector<18x16xf32>
    %cst_5 = arith.constant 0.000000e+00 : f32
    %5 = vector.broadcast %cst_5 : f32 to vector<16x16xf32>
    %6 = vector.broadcast %2 : vector<1x16xf32> to vector<16x16xf32>
    %7 = arith.addf %5, %6 : vector<16x16xf32>
    %8 = vector.extract_strided_slice %4 {offsets = [0, 0], sizes = [16, 16], strides = [1, 1]} : vector<18x16xf32> to vector<16x16xf32>
    %9 = vector.extract_strided_slice %1 {offsets = [0, 0], sizes = [1, 16], strides = [1, 1]} : vector<3x16xf32> to vector<1x16xf32>
    %10 = vector.broadcast %9 : vector<1x16xf32> to vector<16x16xf32>
    %11 = arith.mulf %8, %10 : vector<16x16xf32>
    %12 = arith.addf %7, %11 : vector<16x16xf32>
    %13 = vector.extract_strided_slice %4 {offsets = [1, 0], sizes = [16, 16], strides = [1, 1]} : vector<18x16xf32> to vector<16x16xf32>
    %14 = vector.extract_strided_slice %1 {offsets = [1, 0], sizes = [1, 16], strides = [1, 1]} : vector<3x16xf32> to vector<1x16xf32>
    %15 = vector.broadcast %14 : vector<1x16xf32> to vector<16x16xf32>
    %16 = arith.mulf %13, %15 : vector<16x16xf32>
    %17 = arith.addf %12, %16 : vector<16x16xf32>
    %18 = vector.extract_strided_slice %4 {offsets = [2, 0], sizes = [16, 16], strides = [1, 1]} : vector<18x16xf32> to vector<16x16xf32>
    %19 = vector.extract_strided_slice %1 {offsets = [2, 0], sizes = [1, 16], strides = [1, 1]} : vector<3x16xf32> to vector<1x16xf32>
    %20 = vector.broadcast %19 : vector<1x16xf32> to vector<16x16xf32>
    %21 = arith.mulf %18, %20 : vector<16x16xf32>
    %22 = arith.addf %17, %21 : vector<16x16xf32>
    %c0_6 = arith.constant 0 : index
    %c0_7 = arith.constant 0 : index
    %23 = vector.load %arg4[%c0_6, %c0_7] : memref<16x16xf32, #tpu.memory_space<vmem>>, vector<16x16xf32>
    tpu.vector_store %arg4[%c0_6, %c0_7], %22 {strides = array<i32>} : memref<16x16xf32, #tpu.memory_space<vmem>>, vector<16x16xf32>,
    return
  }
  func.func @transform_0(%arg0: i32) -> (i32, i32) {
    %c0_i32 = arith.constant 0 : i32
    %c0_i32_0 = arith.constant 0 : i32
    return %c0_i32, %arg0 : i32, i32
  }
  func.func @transform_1(%arg0: i32) -> (i32, i32) {
    %c0_i32 = arith.constant 0 : i32
    %c0_i32_0 = arith.constant 0 : i32
    %c0_i32_1 = arith.constant 0 : i32
    return %c0_i32, %c0_i32_0 : i32, i32
  }
  func.func @transform_2(%arg0: i32) -> (i32, i32) {
    %c0_i32 = arith.constant 0 : i32
    %c0_i32_0 = arith.constant 0 : i32
    %c0_i32_1 = arith.constant 0 : i32
    return %c0_i32, %c0_i32_0 : i32, i32
  }
  func.func @transform_3(%arg0: i32) -> (i32, i32) {
    %c0_i32 = arith.constant 0 : i32
    %c0_i32_0 = arith.constant 0 : i32
    return %c0_i32, %arg0 : i32, i32
  }
}

</mosaic_0001>

<bundles_post_ra>
// kernel: tile.13
= control target key start
LH: loop header
LB: loop body
LE: loop exit
PB: predicated region body
PF: predicated region fallthrough
CT: control target
= control target key end

     0   :  { %s103_s0 = inlined_call_operand.vmem [shape: f32[3,2,8], index: 0, kind: input, shape index: {}]   ;;  %s104_s1 = inlined_call_operand.hbm [shape: f32[3,16], index: 1, kind: output, shape index: {}]  }
   0x1   :  { %v42_v0 = vld [vmem:[%s103_s0 + $0x4] sm:$0x3]  ;;  %v43_v1 = vld [vmem:[%s103_s0 + $0x2] sm:$0x3]  ;;  %v14_v2 = vld [vmem:[%s103_s0] sm:$0x3] }
   0x2   :  { %9 = vst [vmem:[#allocation3 + $0x10] sm:$0x3] %v42_v0  ;;  %13 = vst [vmem:[#allocation3 + $0x8] sm:$0x3] %v43_v1 }
   0x3   :  { %15 = vst [vmem:[#allocation3] sm:$0x3] %v14_v2 }
   0x4   :  { %2 = vsyncpa [#allocation1], 0  ;;  %vm17_vm0 = vcmask 64512   ;;  %s70_s0 = smov 8   ;;  %vm23_vm1 = vcmask 130112   ;;  %s71_s12 = smov [#allocation0]  }
   0x5   :  { %s35_s13 = sshll.u32 %s71_s12, 4  ;;  %s36_s13 = int_to_ptr.vmem [resolvable:$true] %s35_s13 }
   0x6   :  { %s46_s14 = scalar_lea.vmem %s36_s13, 64  ;;  %p51_p1 = scmp.lt.s32.totalorder %s36_s13, %s36_s13 }
   0x7   :  { %p47_p0 = scmp.ne.s32.totalorder %s36_s13, %s46_s14  ;;  %p52_p2 = scmp.lt.s32.totalorder %s46_s14, %s46_s14 }
   0x9   :  { %p53_p3 = por %p52_p2, %p51_p1 }
   0xa   :  { %v20_v3 = vld [vmem:[#allocation3 + $0x1] ss:$8 sm:$0x7]   ;;  %v16_v4 = vld [vmem:[#allocation3] ss:$8 sm:$0x7]  }
   0xb   :  { %21 = vrot.lane.b32.xlu0 %v20_v3, %s70_s0  ;;  %18 = vst.msk [vmem:[#allocation2] sm:$0x7] %vm17_vm0, %v16_v4   ;;  %p54_p4 = pnand %p53_p3, %p47_p0 }
  0x7d   :  { %v22_v5 = vpop.permute.xlu0 %21  }
  0x7e   :  { %24 = vst.msk [vmem:[#allocation2] sm:$0x7] %vm23_vm1, %v22_v5  }
  0x85   :  { %v28_v6 = vld [vmem:[#allocation2] sm:$0xf] }
  0x86   :  { %30 = vst [vmem:[#allocation0] sm:$0xf] %v28_v6 }
  0x87   :  { %57 = shalt.err (!%p54_p4)
}
  0x88   :  { %s58_s17 = scalar_lea.hbm %s104_s1, 64 }
  0x89   :  { %p59_p5 = scmp.ne.s32.totalorder %s104_s1, %s58_s17  ;;  %p62_p6 = scmp.lt.u32.totalorder %s58_s17, %s104_s1 }
  0x8b   :  { %p64_p7 = pnand %p62_p6, %p59_p5 }
  0x8d   :  { %67 = shalt.err (!%p64_p7)
}
  0x8e   :  { %38 = dma.vmem_to_hbm [thread:$0]  %s36_s13, 64, %s104_s1, [#allocation1]  }
  0x8f   :  { %68 = dma.done.wait [#allocation1], 64  }
  0x90   :  { %69 = vsyncadd [#allocation1], 4294967232 }
  0x91   :  { %40 = vsyncpa [#allocation1], 1 }

// kernel: depthwise_conv1d.1
= control target key start
LH: loop header
LB: loop body
LE: loop exit
PB: predicated region body
PF: predicated region fallthrough
CT: control target
= control target key end

     0   :  { %8 = vsyncpa [#allocation3], 0  ;;  %s335_s0 = inlined_call_operand.hbm [shape: f32[16,16], index: 0, kind: input, shape index: {}]   ;;  %s336_s1 = inlined_call_operand.hbm [shape: f32[3,16], index: 1, kind: input, shape index: {}]   ;;  %s337_s2 = inlined_call_operand.hbm [shape: f32[1,16], index: 2, kind: input, shape index: {}]   ;;  %s338_s3 = inlined_call_operand.hbm [shape: f32[16,16], index: 3, kind: output, shape index: {}]  }
   0x1   :  { %9 = vsyncpa [#allocation6], 0 }
   0x2   :  { %10 = vsyncpa [#allocation4], 0  ;;  %s244_s12 = smov [#allocation5]   ;;  %s245_s14 = smov [#allocation2]  }
   0x3   :  { %s29_s13 = sshll.u32 %s244_s12, 4  ;;  %s16_s15 = sshll.u32 %s245_s14, 4  ;;  %s30_s13 = int_to_ptr.vmem [resolvable:$true] %s29_s13  ;;  %s270_s15 = int_to_ptr.vmem [resolvable:$true] %s16_s15 }
   0x4   :  { %s150_s18 = scalar_lea.hbm %s336_s1, 64 }
   0x5   :  { %p151_p0 = scmp.ne.s32.totalorder %s336_s1, %s150_s18  ;;  %p154_p1 = scmp.lt.u32.totalorder %s150_s18, %s336_s1 }
   0x7   :  { %p156_p2 = pnand %p154_p1, %p151_p0 }
   0x9   :  { %159 = shalt.err (!%p156_p2)
}
   0xa   :  { %s160_s23 = scalar_lea.vmem %s30_s13, 64  ;;  %p165_p4 = scmp.lt.s32.totalorder %s30_s13, %s30_s13 }
   0xb   :  { %p161_p3 = scmp.ne.s32.totalorder %s30_s13, %s160_s23  ;;  %p166_p5 = scmp.lt.s32.totalorder %s160_s23, %s160_s23 }
   0xd   :  { %p167_p6 = por %p166_p5, %p165_p4 }
   0xf   :  { %p168_p7 = pnand %p167_p6, %p161_p3 }
  0x11   :  { %171 = shalt.err (!%p168_p7)
}
  0x12   :  { %32 = dma.hbm_to_vmem [thread:$0]  %s336_s1, 64, %s30_s13, [#allocation6]  }
  0x13   :  { %s172_s28 = scalar_lea.hbm %s335_s0, 256 }
  0x14   :  { %p173_p8 = scmp.ne.s32.totalorder %s335_s0, %s172_s28  ;;  %p176_p9 = scmp.lt.u32.totalorder %s172_s28, %s335_s0 }
  0x16   :  { %p178_p10 = pnand %p176_p9, %p173_p8 }
  0x18   :  { %181 = shalt.err (!%p178_p10)
}
  0x19   :  { %s182_s6 = scalar_lea.vmem %s270_s15, 256  ;;  %p187_p12 = scmp.lt.s32.totalorder %s270_s15, %s270_s15 }
  0x1a   :  { %p183_p11 = scmp.ne.s32.totalorder %s270_s15, %s182_s6  ;;  %p188_p13 = scmp.lt.s32.totalorder %s182_s6, %s182_s6 }
  0x1c   :  { %p189_p0 = por %p188_p13, %p187_p12 }
  0x1e   :  { %p190_p1 = pnand %p189_p0, %p183_p11 }
  0x20   :  { %193 = shalt.err (!%p190_p1)
}
  0x21   :  { %s246_s1 = smov 128   ;;  %s247_s7 = smov 8  }
  0x22   :  { %22 = dma.hbm_to_vmem [thread:$0]  %s335_s0, 256, %s270_s15, [#allocation3], %s246_s1, %s246_s1, %s247_s7  }
  0x23   :  { %s248_s10 = smov [#allocation7]   ;;  %s194_s14 = scalar_lea.hbm %s337_s2, 16 }
  0x24   :  { %s39_s11 = sshll.u32 %s248_s10, 4  ;;  %p195_p2 = scmp.ne.s32.totalorder %s337_s2, %s194_s14  ;;  %s40_s11 = int_to_ptr.vmem [resolvable:$true] %s39_s11 }
  0x25   :  { %p198_p3 = scmp.lt.u32.totalorder %s194_s14, %s337_s2 }
  0x27   :  { %p200_p4 = pnand %p198_p3, %p195_p2 }
  0x29   :  { %203 = shalt.err (!%p200_p4)
}
  0x2a   :  { %s204_s20 = scalar_lea.vmem %s40_s11, 16  ;;  %s208_s0 = scalar_lea.vmem %s40_s11, 32 }
  0x2b   :  { %p205_p5 = scmp.ne.s32.totalorder %s40_s11, %s204_s20  ;;  %p209_p6 = scmp.lt.s32.totalorder %s40_s11, %s40_s11 }
  0x2c   :  { %p210_p7 = scmp.lt.s32.totalorder %s208_s0, %s204_s20 }
  0x2e   :  { %p211_p8 = por %p210_p7, %p209_p6 }
  0x30   :  { %p212_p9 = pnand %p211_p8, %p205_p5 }
  0x32   :  { %215 = shalt.err (!%p212_p9)
}
  0x33   :  { %42 = dma.hbm_to_vmem [thread:$0]  %s337_s2, 16, %s40_s11, [#allocation6]  }
  0x34   :  { %238 = dma.done.wait [#allocation3], 256  }
  0x35   :  { %239 = vsyncadd [#allocation3], 4294967040 }
  0x36   :  { %240 = dma.done.wait [#allocation6], 80  }
  0x37   :  { %241 = vsyncadd [#allocation6], 4294967216  ;;  %v74_v0 = vlaneseq  ;;  %v52_v5 = vld [vmem:[#allocation2] sm:$0xff]  ;;  %v53_v6 = vld [vmem:[#allocation2 + $0x8] sm:$0xff]  ;;  %vm58_vm0 = vcmask 1040384   ;;  %vm92_vm1 = vcmask 1046528  }
  0x38   :  { %v54_v7 = vld [vmem:[#allocation5] sm:$0x7]  ;;  %v59_v8 = vrot.slane %v52_v5, 7  ;;  %v60_v9 = vrot.slane %v53_v6, 7  ;;  %v143_v13 = vld [vmem:[#allocation7] ss:$0 sm:$0xff] }
  0x39   :  { %v75_v1 = vshrl.u32 %v74_v0, 7  ;;  %vm112_vm2 = vcmask 1045504   ;;  %s249_s2 = smov [#allocation8]   ;;  %vm122_vm3 = vcmask 130048  }
  0x3a   :  { %v61_v14 = vsel %vm58_vm0, %v59_v8, %v60_v9  ;;  %v65_v15 = vsel %vm58_vm0, 0.0, %v59_v8  ;;  %v66_v16 = vsel %vm58_vm0, %v60_v9, 0.0  ;;  %s130_s22 = sshll.u32 %s249_s2, 4  ;;  %s131_s22 = int_to_ptr.vmem [resolvable:$true] %s130_s22 }
  0x3b   :  { %v76_v2 = vsub.s32 0, %v75_v1  ;;  %v84_v3 = vsub.s32 1, %v75_v1  ;;  %v104_v4 = vsub.s32 2, %v75_v1  ;;  %s216_s23 = scalar_lea.vmem %s131_s22, 256  ;;  %p221_p11 = scmp.lt.s32.totalorder %s131_s22, %s131_s22 }
  0x3c   :  { %p217_p10 = scmp.ne.s32.totalorder %s131_s22, %s216_s23  ;;  %p222_p12 = scmp.lt.s32.totalorder %s216_s23, %s216_s23 }
  0x3d   :  { %v77_v10 = vrot.slane %v54_v7, %v76_v2  ;;  %v85_v11 = vrot.slane %v54_v7, %v84_v3  ;;  %v105_v12 = vrot.slane %v54_v7, %v104_v4 }
  0x3e   :  { %p223_p13 = por %p222_p12, %p221_p11 }
  0x3f   :  { %v78_v17 = vmul.f32 %v77_v10, %v65_v15  ;;  %v86_v18 = vmul.f32 %v85_v11, %v65_v15  ;;  %v87_v19 = vmul.f32 %v85_v11, %v61_v14  ;;  %v106_v20 = vmul.f32 %v105_v12, %v65_v15 }
  0x40   :  { %v107_v21 = vmul.f32 %v105_v12, %v61_v14  ;;  %v79_v22 = vmul.f32 %v77_v10, %v61_v14  ;;  %v88_v23 = vmul.f32 %v85_v11, %v66_v16  ;;  %v108_v24 = vmul.f32 %v105_v12, %v66_v16  ;;  %p224_p0 = pnand %p223_p13, %p217_p10 }
  0x41   :  { %v80_v25 = vadd.f32 %v143_v13, %v78_v17  ;;  %v93_v26 = vrot.slane %v86_v18, 1  ;;  %v94_v27 = vrot.slane %v87_v19, 1  ;;  %v113_v28 = vrot.slane %v106_v20, 2 }
  0x42   :  { %v114_v29 = vrot.slane %v107_v21, 2  ;;  %v81_v30 = vadd.f32 %v143_v13, %v79_v22  ;;  %v96_v31 = vrot.slane %v88_v23, 1  ;;  %v116_v32 = vrot.slane %v108_v24, 2 }
  0x43   :  { %v95_v33 = vsel %vm92_vm1, %v93_v26, %v94_v27 }
  0x44   :  { %v100_v34 = vadd.f32 %v95_v33, %v80_v25  ;;  %v115_v35 = vsel %vm112_vm2, %v113_v28, %v114_v29  ;;  %v97_v36 = vsel %vm92_vm1, %v94_v27, %v96_v31  ;;  %v117_v37 = vsel %vm112_vm2, %v114_v29, %v116_v32 }
  0x45   :  { %v101_v38 = vadd.f32 %v97_v36, %v81_v30 }
  0x46   :  { %v120_v39 = vadd.f32 %v115_v35, %v100_v34 }
  0x47   :  { %v121_v40 = vadd.f32 %v117_v37, %v101_v38 }
  0x48   :  { %123 = vst.msk [vmem:[#allocation8] sm:$0xff] %vm122_vm3, %v120_v39 }
  0x49   :  { %124 = vst.msk [vmem:[#allocation8 + $0x8] sm:$0xff] %vm122_vm3, %v121_v40 }
  0x4a   :  { %227 = shalt.err (!%p224_p0)
}
  0x4b   :  { %s228_s26 = scalar_lea.hbm %s338_s3, 256 }
  0x4c   :  { %p229_p1 = scmp.ne.s32.totalorder %s338_s3, %s228_s26  ;;  %p232_p2 = scmp.lt.u32.totalorder %s228_s26, %s338_s3 }
  0x4e   :  { %p234_p3 = pnand %p232_p2, %p229_p1 }
  0x50   :  { %237 = shalt.err (!%p234_p3)
}
  0x51   :  { %136 = dma.vmem_to_hbm [thread:$0]  %s131_s22, 256, %s338_s3, [#allocation4], %s246_s1, %s246_s1, %s247_s7  }
  0x52   :  { %242 = dma.done.wait [#allocation4], 256  }
  0x53   :  { %243 = vsyncadd [#allocation4], 4294967040 }
  0x54   :  { %140 = vsyncpa [#allocation3], 1 }
  0x55   :  { %141 = vsyncpa [#allocation6], 1 }
  0x56   :  { %142 = vsyncpa [#allocation4], 1 }

</bundles_post_ra>
